<compile_context>
chip_gen: v7x
topology: tpu7x:2x2x1
jax: 0.10.0
libtpu: 0.0.40
codegen_flags: <defaults>
</compile_context>

<pallas_src>
import jax
import jax.numpy as jnp
from jax.experimental import pallas as pl
from jax.experimental.pallas import tpu as pltpu


# ----------------------------- fused text-head kernel -----------------------------
# One grid step = a block of TB sequences.
#   x_ref  : (TB, L, Dw)  BERT features, bf16 (streamed)
#   wt_ref : (Dw, Do)     linear_text weight, bf16 (resident across grid steps)
#   bt_ref : (1, Do)      linear_text bias, f32
#   wa_ref : (1, Do)      word_attn weight (transposed), f32
#   y_ref  : (TB, L, Do)  per-word embeddings out, bf16
#   g_ref  : (TB, Do)     attention-pooled sentence embeddings out, bf16

def _lan_head_kernel(x_ref, wt_ref, bt_ref, wa_ref, y_ref, g_ref):
    tb, l, dw = x_ref.shape
    do = wt_ref.shape[1]

    # bf16 operands feed the MXU directly; accumulation stays f32.
    # Collapsing (TB, L) is layout-free while L is a multiple of the sublane packing
    # (L = 16 here); for odd L it may cost a VMEM relayout (perf, not correctness).
    x = x_ref[...].reshape(tb * l, dw)
    wt = wt_ref[...]
    bt = bt_ref[...].astype(jnp.float32)                      # (1, Do)
    wa = wa_ref[...].astype(jnp.float32)                      # (1, Do)

    # linear_text on the MXU: (TB*L, Dw) @ (Dw, Do), f32 accumulation.
    y2 = jnp.dot(x, wt, preferred_element_type=jnp.float32) + bt
    y = y2.reshape(tb, l, do)                                  # (TB, L, Do) f32

    # word-attention logits on a lane-denser (TB, L) view.
    # torch: Linear(out_dim -> 1) then Softmax(dim=-2); b_attn omitted (softmax-invariant).
    logits = jnp.sum(y * wa, axis=-1)                          # (TB, L)
    m = jnp.max(logits, axis=-1, keepdims=True)
    p = jnp.exp(logits - m)
    attn = p / jnp.sum(p, axis=-1, keepdims=True)              # (TB, L), rows sum to 1

    g = jnp.sum(y * attn[:, :, None], axis=1)                  # (TB, Do)

    y_ref[...] = y.astype(y_ref.dtype)
    g_ref[...] = g.astype(g_ref.dtype)


# ------------------------------ tiling / VMEM sizing -------------------------------

def _vmem_capacity_bytes():
    """Per-TensorCore VMEM capacity (64 MiB on v7x, 128 MiB on v5e/v6e)."""
    cap = None
    try:
        cap = int(pltpu.get_tpu_info().vmem_capacity_bytes)
    except Exception:
        cap = None
    try:
        kind = jax.devices()[0].device_kind.lower()
    except Exception:
        kind = ""
    if cap is None:
        cap = 128 * 1024 * 1024 if ("v5" in kind or "v6" in kind) else 64 * 1024 * 1024
    if "v7" in kind:
        cap = min(cap, 64 * 1024 * 1024)   # never size a v7x tile against 128 MiB
    return cap


def _pick_row_block(n, l, dw, do, vmem_budget_bytes, io_itemsize):
    """Largest 8-aligned row block that fits the VMEM budget, while keeping >= 2 grid
    steps so ("parallel",) can shard rows across v7x's two TensorCores."""
    if n <= 8:
        return n  # one full (possibly sub-8) block; "== full dim" satisfies the sublane rule
    # Per-row VMEM bytes:
    #   * double-buffered HBM-facing blocks (bf16): x in (L*Dw) + y out (L*Do) + g out (Do)
    #   * single-buffered in-kernel f32 temporaries: y2 / weighted copy (~2 * L*Do) + misc
    per_row = (2 * (l * dw + l * do + do) * io_itemsize
               + 2 * l * do * 4 + (l + do) * 4)
    # Resident (constant index_map) weight blocks are still double-buffered by the pipeline.
    resident = 2 * (dw * do * io_itemsize + 2 * do * 4)
    cap_rows = max(8, ((vmem_budget_bytes - resident) // per_row) // 8 * 8)
    half_up = (((n + 1) // 2) + 7) // 8 * 8        # ceil(N/2), rounded up to a sublane group
    return max(8, min(cap_rows, half_up))


def lan_text_head(feats, w_text, b_text, w_attn, *, row_block=None):
    """Fused linear_text + word-attention softmax pooling.  feats: (N, L, Dw), bf16."""
    n, l, dw = feats.shape
    do = w_text.shape[1]
    out_dtype = feats.dtype
    io_itemsize = jnp.dtype(out_dtype).itemsize

    vmem_cap = _vmem_capacity_bytes()
    block_budget = min(int(vmem_cap * 0.6), 80 * 1024 * 1024)
    vmem_limit = max(32 * 1024 * 1024, min(int(vmem_cap * 0.85), 112 * 1024 * 1024))

    tb = row_block if row_block is not None else _pick_row_block(
        n, l, dw, do, block_budget, io_itemsize)
    assert tb == n or tb % 8 == 0, f"row_block {tb} must be 8-aligned or equal N={n}"
    grid = (pl.cdiv(n, tb),)   # ragged last block is fine: rows are independent

    y, g = pl.pallas_call(
        _lan_head_kernel,
        out_shape=(jax.ShapeDtypeStruct((n, l, do), out_dtype),
                   jax.ShapeDtypeStruct((n, do), out_dtype)),
        grid=grid,
        in_specs=[
            pl.BlockSpec((tb, l, dw), lambda i: (i, 0, 0)),   # streamed feature rows
            pl.BlockSpec((dw, do), lambda i: (0, 0)),         # resident weights
            pl.BlockSpec((1, do), lambda i: (0, 0)),
            pl.BlockSpec((1, do), lambda i: (0, 0)),
        ],
        out_specs=(
            pl.BlockSpec((tb, l, do), lambda i: (i, 0, 0)),
            pl.BlockSpec((tb, do), lambda i: (i, 0)),
        ),
        compiler_params=pltpu.CompilerParams(
            dimension_semantics=("parallel",),                # megacore sharding on v7x
            vmem_limit_bytes=vmem_limit),
    )(feats,
      w_text.astype(out_dtype),                               # bf16 MXU operand
      b_text.reshape(1, do).astype(jnp.float32),
      w_attn.reshape(1, do).astype(jnp.float32))              # (Do, 1) -> (1, Do)
    return g, y


# --------------------------------- module wrapper ---------------------------------

class LanModel:
    """Pallas port of LanModel's forward pass (language-embedding head)."""

    def __init__(self, vocab_size, word_dim=128, out_dim=128, seed=0):
        # The reference forward applies word_attn = Linear(word_dim, 1) to the
        # *linear_text output* (out_dim features), so it is only well defined when
        # word_dim == out_dim; keep that requirement.
        assert word_dim == out_dim, "reference forward requires word_dim == out_dim"
        self.word_dim, self.out_dim = word_dim, out_dim
        k = jax.random.PRNGKey(seed)
        k_emb, k_wt, k_bt, k_wa = jax.random.split(k, 4)
        # TODO(synk): the pretrained BERT encoder (external module + tokenizer) has no
        # in-script Pallas equivalent; stood in by a deterministic embedding lookup.
        # TODO(synk): if this embedding stand-in were permanent, the gather could be fused
        # into the pallas_call (token ids as scalar prefetch / in-kernel take); with a real
        # BERT the features arrive from the encoder, so the gather stays outside.
        self.embed = (0.02 * jax.random.normal(
            k_emb, (vocab_size, word_dim), jnp.float32)).astype(jnp.bfloat16)
        self.w_text = 0.02 * jax.random.normal(k_wt, (word_dim, out_dim), jnp.float32)
        self.b_text = 0.02 * jax.random.normal(k_bt, (out_dim,), jnp.float32)
        self.w_attn = 0.02 * jax.random.normal(k_wa, (out_dim, 1), jnp.float32)
        # Kept for parity with the PyTorch module, but never enters the kernel: adding a
        # scalar before a softmax over the word axis is softmax-invariant.
        self.b_attn = jnp.zeros((1,), jnp.float32)

    def _bert(self, token_ids):
        # bf16 features: halves HBM traffic of the bandwidth-bound head kernel.
        return jnp.take(self.embed, token_ids, axis=0)         # (..., L, word_dim) bf16

    def __call__(self, answer, *, row_block=None):
        if answer.ndim == 3:
            bs, nans, lans = answer.shape
            feats = self._bert(answer.reshape(bs * nans, lans))
            g, y = lan_text_head(feats, self.w_text, self.b_text, self.w_attn,
                                 row_block=row_block)
            return g.reshape(bs, nans, -1), y.reshape(bs, nans, lans, -1)
        feats = self._bert(answer)
        g, y = lan_text_head(feats, self.w_text, self.b_text, self.w_attn,
                             row_block=row_block)
        return g, y


if __name__ == "__main__":
    vocab, word_dim, out_dim = 64, 128, 128
    bs, nans, lans = 2, 5, 16      # 3-D branch: N = 10 -> tb = 8 -> grid=(2,), ragged tail

    model = LanModel(vocab_size=vocab, word_dim=word_dim, out_dim=out_dim, seed=0)
    key = jax.random.PRNGKey(0)
    k3, k2 = jax.random.split(key)

    def ref_head(feats_bf16):
        x = feats_bf16.astype(jnp.float32)
        wt = model.w_text.astype(jnp.bfloat16).astype(jnp.float32)
        y = x @ wt + model.b_text
        attn = jax.nn.softmax(y @ model.w_attn + model.b_attn, axis=-2)
        return (y * attn).sum(axis=1), y

    # 3-D branch: exercises the >= 2-step parallel grid and the ragged last block.
    ans3 = jax.random.randint(k3, (bs, nans, lans), 0, vocab, dtype=jnp.int32)
    g3, y3 = model(ans3)
    jax.block_until_ready((g3, y3))
    assert g3.shape == (bs, nans, out_dim)
    assert y3.shape == (bs, nans, lans, out_dim)
    g3_ref, y3_ref = ref_head(model._bert(ans3.reshape(bs * nans, lans)))
    assert jnp.allclose(y3.reshape(bs * nans, lans, -1).astype(jnp.float32), y3_ref,
                        atol=2e-3, rtol=5e-2), "3-D per-word output mismatch"
    assert jnp.allclose(g3.reshape(bs * nans, -1).astype(jnp.float32), g3_ref,
                        atol=2e-3, rtol=5e-2), "3-D pooled output mismatch"

    # 2-D branch: (bs, lans) token ids -> single full block (N <= 8).
    ans2 = jax.random.randint(k2, (bs, lans), 0, vocab, dtype=jnp.int32)
    g2, y2 = model(ans2)
    jax.block_until_ready((g2, y2))
    assert g2.shape == (bs, out_dim)
    assert y2.shape == (bs, lans, out_dim)
    g2_ref, y2_ref = ref_head(model._bert(ans2))
    assert jnp.allclose(y2.astype(jnp.float32), y2_ref,
                        atol=2e-3, rtol=5e-2), "2-D per-word output mismatch"
    assert jnp.allclose(g2.astype(jnp.float32), g2_ref,
                        atol=2e-3, rtol=5e-2), "2-D pooled output mismatch"

    print("KERNEL_OK")
</pallas_src>

<mosaic_0001>
module attributes {stable_mosaic.version = 11 : i64} {
  func.func @_lan_head_kernel(%arg0: i32, %arg1: memref<8x16x128xbf16, #tpu.memory_space<vmem>>, %arg2: memref<128x128xbf16, #tpu.memory_space<vmem>>, %arg3: memref<1x128xf32, #tpu.memory_space<vmem>>, %arg4: memref<1x128xf32, #tpu.memory_space<vmem>>, %arg5: memref<8x16x128xbf16, #tpu.memory_space<vmem>>, %arg6: memref<8x128xbf16, #tpu.memory_space<vmem>>) attributes {dimension_semantics = [#tpu.dimension_semantics<parallel>], iteration_bounds = array<i64: 2>, scalar_prefetch = 0 : i64, scratch_operands = 0 : i64, tpu.core_type = #tpu.core_type<tc>, window_params = [{transform_indices = @transform_0, window_bounds = array<i64: 8, 16, 128>}, {pipeline_mode = #tpu.pipeline_mode<synchronous>, transform_indices = @transform_1, window_bounds = array<i64: 128, 128>}, {pipeline_mode = #tpu.pipeline_mode<synchronous>, transform_indices = @transform_2, window_bounds = array<i64: 1, 128>}, {pipeline_mode = #tpu.pipeline_mode<synchronous>, transform_indices = @transform_3, window_bounds = array<i64: 1, 128>}, {transform_indices = @transform_4, window_bounds = array<i64: 8, 16, 128>}, {transform_indices = @transform_5, window_bounds = array<i64: 8, 128>}]} {
    %c0 = arith.constant 0 : index
    %c0_0 = arith.constant 0 : index
    %c0_1 = arith.constant 0 : index
    %0 = vector.load %arg1[%c0, %c0_0, %c0_1] : memref<8x16x128xbf16, #tpu.memory_space<vmem>>, vector<8x16x128xbf16>
    %1 = vector.shape_cast %0 : vector<8x16x128xbf16> to vector<128x128xbf16>
    %c0_2 = arith.constant 0 : index
    %c0_3 = arith.constant 0 : index
    %2 = vector.load %arg2[%c0_2, %c0_3] : memref<128x128xbf16, #tpu.memory_space<vmem>>, vector<128x128xbf16>
    %c0_4 = arith.constant 0 : index
    %c0_5 = arith.constant 0 : index
    %3 = vector.load %arg3[%c0_4, %c0_5] : memref<1x128xf32, #tpu.memory_space<vmem>>, vector<1x128xf32>
    %c0_6 = arith.constant 0 : index
    %c0_7 = arith.constant 0 : index
    %4 = vector.load %arg4[%c0_6, %c0_7] : memref<1x128xf32, #tpu.memory_space<vmem>>, vector<1x128xf32>
    %cst = arith.constant dense<0.000000e+00> : vector<128x128xf32>
    %5 = tpu.matmul %1, %2, %cst {dimension_numbers = #tpu.dot_dimension_numbers<[1], [0], [0], [1], [0, 0, 1, 1], [], []>} : vector<128x128xbf16>, vector<128x128xbf16>, vector<128x128xf32> -> vector<128x128xf32>
    %6 = vector.broadcast %3 : vector<1x128xf32> to vector<128x128xf32>
    %7 = arith.addf %5, %6 : vector<128x128xf32>
    %8 = vector.shape_cast %7 : vector<128x128xf32> to vector<8x16x128xf32>
    %9 = vector.shape_cast %4 : vector<1x128xf32> to vector<1x1x128xf32>
    %10 = vector.broadcast %9 : vector<1x1x128xf32> to vector<8x16x128xf32>
    %11 = arith.mulf %8, %10 : vector<8x16x128xf32>
    %cst_8 = arith.constant dense<0.000000e+00> : vector<8x16xf32>
    %12 = vector.multi_reduction <add>, %11, %cst_8 [2] : vector<8x16x128xf32> to vector<8x16xf32>
    %cst_9 = arith.constant dense<0xFF800000> : vector<8xf32>
    %13 = vector.multi_reduction <maximumf>, %12, %cst_9 [1] : vector<8x16xf32> to vector<8xf32>
    %14 = vector.shape_cast %13 : vector<8xf32> to vector<8x1xf32>
    %15 = vector.broadcast %14 : vector<8x1xf32> to vector<8x16xf32>
    %16 = arith.subf %12, %15 : vector<8x16xf32>
    %17 = math.exp %16 : vector<8x16xf32>
    %cst_10 = arith.constant dense<0.000000e+00> : vector<8xf32>
    %18 = vector.multi_reduction <add>, %17, %cst_10 [1] : vector<8x16xf32> to vector<8xf32>
    %19 = vector.shape_cast %18 : vector<8xf32> to vector<8x1xf32>
    %20 = vector.broadcast %19 : vector<8x1xf32> to vector<8x16xf32>
    %21 = arith.divf %17, %20 : vector<8x16xf32>
    %22 = vector.shape_cast %21 : vector<8x16xf32> to vector<8x16x1xf32>
    %23 = vector.broadcast %22 : vector<8x16x1xf32> to vector<8x16x128xf32>
    %24 = arith.mulf %8, %23 : vector<8x16x128xf32>
    %cst_11 = arith.constant dense<0.000000e+00> : vector<8x128xf32>
    %25 = vector.multi_reduction <add>, %24, %cst_11 [1] : vector<8x16x128xf32> to vector<8x128xf32>
    %26 = arith.truncf %8 : vector<8x16x128xf32> to vector<8x16x128xbf16>
    %c0_12 = arith.constant 0 : index
    %c0_13 = arith.constant 0 : index
    %c0_14 = arith.constant 0 : index
    %27 = vector.load %arg5[%c0_12, %c0_13, %c0_14] : memref<8x16x128xbf16, #tpu.memory_space<vmem>>, vector<8x16x128xbf16>
    tpu.vector_store %arg5[%c0_12, %c0_13, %c0_14], %26 {strides = array<i32>} : memref<8x16x128xbf16, #tpu.memory_space<vmem>>, vector<8x16x128xbf16>,
    %28 = arith.truncf %25 : vector<8x128xf32> to vector<8x128xbf16>
    %c0_15 = arith.constant 0 : index
    %c0_16 = arith.constant 0 : index
    %29 = vector.load %arg6[%c0_15, %c0_16] : memref<8x128xbf16, #tpu.memory_space<vmem>>, vector<8x128xbf16>
    tpu.vector_store %arg6[%c0_15, %c0_16], %28 {strides = array<i32>} : memref<8x128xbf16, #tpu.memory_space<vmem>>, vector<8x128xbf16>,
    return
  }
  func.func @transform_0(%arg0: i32) -> (i32, i32, i32) {
    %c0_i32 = arith.constant 0 : i32
    %c0_i32_0 = arith.constant 0 : i32
    %c0_i32_1 = arith.constant 0 : i32
    return %arg0, %c0_i32, %c0_i32_0 : i32, i32, i32
  }
  func.func @transform_1(%arg0: i32) -> (i32, i32) {
    %c0_i32 = arith.constant 0 : i32
    %c0_i32_0 = arith.constant 0 : i32
    %c0_i32_1 = arith.constant 0 : i32
    return %c0_i32, %c0_i32_0 : i32, i32
  }
  func.func @transform_2(%arg0: i32) -> (i32, i32) {
    %c0_i32 = arith.constant 0 : i32
    %c0_i32_0 = arith.constant 0 : i32
    %c0_i32_1 = arith.constant 0 : i32
    return %c0_i32, %c0_i32_0 : i32, i32
  }
  func.func @transform_3(%arg0: i32) -> (i32, i32) {
    %c0_i32 = arith.constant 0 : i32
    %c0_i32_0 = arith.constant 0 : i32
    %c0_i32_1 = arith.constant 0 : i32
    return %c0_i32, %c0_i32_0 : i32, i32
  }
  func.func @transform_4(%arg0: i32) -> (i32, i32, i32) {
    %c0_i32 = arith.constant 0 : i32
    %c0_i32_0 = arith.constant 0 : i32
    %c0_i32_1 = arith.constant 0 : i32
    return %arg0, %c0_i32, %c0_i32_0 : i32, i32, i32
  }
  func.func @transform_5(%arg0: i32) -> (i32, i32) {
    %c0_i32 = arith.constant 0 : i32
    %c0_i32_0 = arith.constant 0 : i32
    return %arg0, %c0_i32 : i32, i32
  }
}

</mosaic_0001>

<bundles_post_ra>
// kernel: tpu_custom_call.1
= control target key start
LH: loop header
LB: loop body
LE: loop exit
PB: predicated region body
PF: predicated region fallthrough
CT: control target
= control target key end

     0   :  { %11 = vsyncpa [#allocation3], 0  ;;  %s2589_s0 = inlined_call_operand.hbm [shape: bf16[10,16,128], index: 0, kind: input, shape index: {}]   ;;  %s2590_s1 = inlined_call_operand.hbm [shape: bf16[128,128], index: 1, kind: input, shape index: {}]   ;;  %s2591_s2 = inlined_call_operand.vmem [shape: f32[1,128], index: 2, kind: input, shape index: {}]   ;;  %s2592_s3 = inlined_call_operand.vmem [shape: f32[1,128], index: 3, kind: input, shape index: {}]   ;;  %s2593_s4 = inlined_call_operand.hbm [shape: bf16[10,16,128], index: 4, kind: output, shape index: {0}]   ;;  %s2594_s5 = inlined_call_operand.hbm [shape: bf16[10,128], index: 5, kind: output, shape index: {1}]  }
   0x1   :  { %13 = vsyncpa [#allocation3 + $0x1], 0 }
   0x2   :  { %14 = vsyncpa [#allocation6], 0 }
   0x3   :  { %15 = vsyncpa [#allocation4], 0 }
   0x4   :  { %17 = vsyncpa [#allocation4 + $0x1], 0 }
   0x5   :  { %18 = vsyncpa [#allocation9], 0 }
   0x6   :  { %20 = vsyncpa [#allocation9 + $0x1], 0  ;;  %s1977_s18 = smov 0   ;;  %s1979_s19 = smov 0  }
   0x7   :  { %s1981_s20 = smov 0   ;;  %s1983_s21 = smov 0  }
   0x8 LB: > { %s1998_s22 = sadd.s32 4294967295, %s1934_s21   ;;  %s1428_s23 = sadd.s32 4294967294, %s1934_s21   ;;  %s1934_s21 = sphi %s1983_s21, %s2623_s21   ;;  %s1930_s20 = sphi %s1981_s20, %s2622_s20   ;;  %s1926_s19 = sphi %s1979_s19, %s2621_s19   ;;  %s1922_s18 = sphi %s1977_s18, %s2620_s18  }
   0x9   : > { %s2002_s24 = sadd.s32 1, %s1934_s21   ;;  %s33_s25 = sadd.s32 1, %s1930_s20 }
   0xa   : > { %s30_s26 = ssub.s32 %s1934_s21, %s2002_s24  ;;  %p40_p0 = scmp.ne.s32.totalorder %s1930_s20, %s1926_s19 }
   0xb   : > { %p31_p1 = scmp.eq.s32.totalorder %s30_s26, 0  ;;  %p41_p2 = scmp.eq.s32.totalorder %s1934_s21, 0 }
   0xc   : > { %p46_p3 = scmp.ne.s32.totalorder %s1926_s19, %s1922_s18  ;;  %p2595_p4 = scmp.eq.s32.totalorder %s1998_s22, 0 }
   0xd   : > { %s2014_s27 = scalar_select %p31_p1, %s1930_s20, %s33_s25  }
   0xe   : > { %p2016_p5 = por %p41_p2, %p40_p0  ;;  %p2022_p6 = por %p2595_p4, %p46_p3 }
   0xf   : > { %p133_p7 = scmp.eq.s32.totalorder %s1998_s22, 1  ;;  %p139_p8 = scmp.eq.s32.totalorder %s1428_s23, 1 }
  0x10   : > { %s2602_s28 = scalar_select %p2016_p5, 1, 0 }
  0x11   : > { %s2603_s29 = scalar_select %p2022_p6, 1, 0 }
  0x12   : > { %p1429_p9 = scmp.ge.s32.totalorder %s1934_s21, 1  ;;  %p172_p10 = scmp.lt.s32.totalorder %s1934_s21, 3 }
  0x13   : > { %p2029_p11 = por %p133_p7, %p40_p0  ;;  %p2033_p12 = por %p139_p8, %p46_p3 }
  0x14   : > { %p2037_p13 = pnand %p1429_p9, %p172_p10  ;;  %s1936_s8 = smov [#allocation5]  }
  0x15   : > { %s2604_s30 = scalar_select %p2029_p11, 1, 0 }
  0x16   : > { %s2605_s6 = scalar_select %p2033_p12, 1, 0 }
  0x17   : > { %s2606_s7 = scalar_select %p2037_p13, 1, 0 }
  0x18   : > { %p1656_p1 = pneg %p2037_p13  ;;  %s184_s9 = sshll.u32 %s1936_s8, 4  ;;  %s185_s9 = int_to_ptr.vmem [resolvable:$true] %s184_s9 }
  0x19   : > { %s1776_s13 = scalar_lea.hbm %s2590_s1, 1024 }
  0x1a   : > { %p2045_p2 = pnand %p1656_p1, %p2595_p4  ;;  %p1777_p0 = scmp.ne.s32.totalorder %s2590_s1, %s1776_s13 }
  0x1b   : > { %p1783_p9 = scmp.lt.u32.totalorder %s1776_s13, %s2590_s1 }
  0x1c   : > { %p1778_p3 = pneg %p2045_p2 }
  0x1e   : > { %p1779_p7 = pnand %p1778_p3, %p1777_p0 }
  0x20   : > { %p1780_p8 = pneg %p1779_p7 }
  0x22   : > { %p1785_p10 = pnand %p1783_p9, %p1780_p8 }
  0x24   : > { %1788 = shalt.err (!%p1785_p10)
}
  0x25   : > { %s1789_s23 = scalar_lea.vmem %s185_s9, 1024  ;;  %p1797_p11 = scmp.lt.s32.totalorder %s185_s9, %s185_s9 }
  0x26   : > { %p1790_p1 = scmp.ne.s32.totalorder %s185_s9, %s1789_s23  ;;  %p1798_p6 = scmp.lt.s32.totalorder %s1789_s23, %s1789_s23 }
  0x28   : > { %p1792_p4 = pnand %p1790_p1, %p1778_p3  ;;  %p1799_p13 = por %p1798_p6, %p1797_p11 }
  0x2a   : > { %p1793_p12 = pneg %p1792_p4 }
  0x2c   : > { %p1800_p5 = pnand %p1799_p13, %p1793_p12 }
  0x2e   : > { %1803 = shalt.err (!%p1800_p5)
}
  0x2f   : > { %s1937_s25 = smov 64   ;;  %s1938_s26 = smov 4  }
  0x30   : > { %1659 = dma.hbm_to_vmem [thread:$0]  (!%p2045_p2), %s2590_s1, 1024, %s185_s9, [#allocation6], %s1937_s25, %s1937_s25, %s1938_s26  }
  0x31   : > { %p1431_p0 = scmp.ge.s32.totalorder %s1934_s21, 2 }
  0x32   : > { %p2608_p4 = scmp.ne.s32.totalorder (!%p1431_p0), %s2602_s28, 0 }
  0x33   : > { %200 = sbr.rel (%p1431_p0) target bundleno = 93 (0x5d), region = 28 }
  0x3a   : > { %203 = sbr.rel (!%p2608_p4) target bundleno = 93 (0x5d), region = 32  ;;  %s204_s12 = sand.u32 (%p2608_p4), 1, %s1930_s20  }
  0x3b   : > { %s1433_s13 = sshll.u32 (%p2608_p4), %s1934_s21, 3  ;;  %s1432_s14 = sshll.u32 (%p2608_p4), %s204_s12, 6 }
  0x3c   : > { %s210_s15 = ssub.s32 (%p2608_p4), 10, %s1433_s13  ;;  %s2075_s16 = scalar_lea.sflag (%p2608_p4), [#allocation3], %s204_s12 }
  0x3d   : > { %p211_p5 = scmp.lt.s32.totalorder (%p2608_p4), %s210_s15, 8  ;;  %s208_s17 = scalar_lea.vmem (%p2608_p4), [#allocation2], %s1432_s14 }
  0x41   : > { %s2625_s15 = smov (!%p211_p5, %s210_s15), 8 }
  0x42   : > { %s2072_s10 = sshll.u32 %s2625_s15, 7 }
  0x43   : > { %s216_s9 = ssub.s32 1024, %s2072_s10 }
  0x44   : > { %217 = vsyncadd %s2075_s16, %s216_s9  ;;  %p1436_p6 = scmp.ne.s32.totalorder %s2072_s10, 0  ;;  %s1505_s28 = sshll.u32 %s1934_s21, 10 }
  0x45   : > { %s2083_s26 = scalar_lea.hbm %s2589_s0, %s1505_s28  ;;  %s224_s8 = sshll.u32 %s208_s17, 4  ;;  %s2085_s8 = int_to_ptr.vmem [resolvable:$true] %s224_s8 }
  0x46   : > { %s1804_s11 = scalar_lea.hbm %s2083_s26, %s2072_s10  ;;  %s1808_s14 = scalar_lea.hbm %s2589_s0, 1280 }
  0x47   : > { %p1805_p11 = scmp.ne.s32.totalorder %s2083_s26, %s1804_s11  ;;  %p1809_p2 = scmp.lt.u32.totalorder %s2083_s26, %s2589_s0 }
  0x48   : > { %p1810_p3 = scmp.lt.u32.totalorder %s1808_s14, %s1804_s11  ;;  %p1812_p8 = scmp.lt.u32.totalorder %s1804_s11, %s2083_s26 }
  0x49   : > { %p1806_p12 = pnand %p1805_p11, %p1436_p6 }
  0x4a   : > { %p1811_p7 = por %p1810_p3, %p1809_p2 }
  0x4b   : > { %p1807_p13 = pneg %p1806_p12 }
  0x4c   : > { %p1813_p9 = por %p1812_p8, %p1811_p7 }
  0x4e   : > { %p1814_p10 = pnand %p1813_p9, %p1807_p13 }
  0x50   : > { %1817 = shalt.err (!%p1814_p10)
}
  0x51   : > { %s1818_s17 = scalar_lea.vmem %s2085_s8, %s2072_s10  ;;  %s1939_s28 = smov [#allocation2]  }
  0x52   : > { %p1819_p1 = scmp.ne.s32.totalorder %s2085_s8, %s1818_s17  ;;  %s1822_s23 = sshll.u32 %s1939_s28, 4  ;;  %s1823_s23 = int_to_ptr.vmem [resolvable:$false] %s1822_s23 }
  0x53   : > { %s1824_s25 = scalar_lea.vmem %s1823_s23, 2048  ;;  %p1825_p11 = scmp.lt.s32.totalorder %s2085_s8, %s1823_s23 }
  0x54   : > { %p1820_p4 = pnand %p1819_p1, %p1436_p6  ;;  %p1826_p12 = scmp.lt.s32.totalorder %s1824_s25, %s1818_s17 }
  0x56   : > { %p1821_p5 = pneg %p1820_p4  ;;  %p1827_p2 = por %p1826_p12, %p1825_p11 }
  0x58   : > { %p1828_p3 = pnand %p1827_p2, %p1821_p5 }
  0x5a   : > { %1831 = shalt.err (!%p1828_p3)
}
  0x5b   : > { %s1940_s11 = smov 64   ;;  %s1941_s12 = smov 4  }
  0x5c   : > { %230 = dma.hbm_to_vmem [thread:$0]  (%p1436_p6), %s2083_s26, %s2072_s10, %s2085_s8, %s2075_s16, %s1940_s11, %s1940_s11, %s1941_s12  }
  0x5d PF: > { %p2609_p13 = scmp.ne.s32.totalorder %s2606_s7, 0 }
  0x5e   : > { %s2115_s13 = sand.u32 (!%p2609_p13), 1, %s1926_s19   ;;  %p2610_p7 = scmp.ne.s32.totalorder (!%p2609_p13), %s2603_s29, 0 }
  0x5f   : > { %236 = sbr.rel (%p2609_p13) target bundleno = 1282 (0x502), region = 36  ;;  %s1443_s14 = sshll.u32 (!%p2609_p13), %s2115_s13, 6 }
  0x60   : > { %s239_s15 = scalar_lea.sflag (!%p2609_p13), [#allocation3], %s2115_s13  ;;  %s2121_s9 = scalar_lea.vmem (!%p2609_p13), [#allocation2], %s1443_s14 }
  0x66   : > { %1905 = dma.done.wait (%p2610_p7), %s239_s15, 1024  }
  0x67   : > { %1907 = vsyncadd (%p2610_p7), %s239_s15, 4294966272  ;;  %p2611_p6 = scmp.eq.s32.totalorder %s1998_s22, 0 }
  0x69   : > { %1909 = dma.done.wait (%p2611_p6), [#allocation6], 1024   ;;  %p2612_p8 = pmov %p2611_p6 }
  0x6a   : > { %v1712_v0 = vld [vmem:[#allocation5] sm:$0xff]   ;;  %v1713_v1 = vld [vmem:[#allocation5 + $0x8] sm:$0xff]   ;;  %v1714_v2 = vld [vmem:[#allocation5 + $0x10] sm:$0xff]   ;;  %s2177_s26 = scalar_lea.vmem [#allocation7], %s1443_s14  ;;  %vm605_vm0 = vcmask 130112   ;;  %vm670_vm1 = vcmask 1041409  }
  0x6b   : > { %1911 = vsyncadd (%p2612_p8), [#allocation6], 4294966272  ;;  %1600 = vmatprep.subr.bf16.mxu0 %v1712_v0  ;;  %1632 = vmatprep.subr.bf16.mxu1 %v1712_v0  ;;  %v1715_v3 = vld [vmem:[#allocation5 + $0x18] sm:$0xff]   ;;  %v1720_v4 = vld [vmem:[%s2121_s9] sm:$0xff]   ;;  %vm672_vm2 = vcmask 1042434   ;;  %vm674_vm3 = vcmask 1043459  }
  0x6c   : > { %1601 = vmatpush3.bf16.msra.mxu0 %v1712_v0  ;;  %1640 = vmatpush3.bf16.msra.mxu1 %v1712_v0  ;;  %v1721_v5 = vld [vmem:[%s2121_s9 + $0x20] sm:$0xff]   ;;  %v1717_v7 = vld [vmem:[#allocation5 + $0x28] sm:$0xff]   ;;  %v1718_v8 = vld [vmem:[#allocation5 + $0x30] sm:$0xff]   ;;  %vm676_vm4 = vcmask 1044484   ;;  %vm678_vm5 = vcmask 1045509   ;;  %vm680_vm6 = vcmask 1046534  }
  0x6d   : > { %1602 = vmatprep.subr.bf16.mxu0 %v1713_v1  ;;  %1633 = vmatprep.subr.bf16.mxu1 %v1713_v1  ;;  %v1716_v6 = vld [vmem:[#allocation5 + $0x20] sm:$0xff]   ;;  %v1719_v9 = vld [vmem:[#allocation5 + $0x38] sm:$0xff]   ;;  %v1722_v10 = vld [vmem:[%s2121_s9 + $0x8] sm:$0xff]   ;;  %vm682_vm7 = vcmask 1047559   ;;  %vm685_vm8 = vcmask 130048   ;;  %s1446_s8 = sshll.u32 %s2115_s13, 2 }
  0x6e   : > { %1616 = vmatprep.mubr.bf16.mxu0 %v1720_v4  ;;  %1624 = vmatprep.mubr.bf16.mxu1 %v1721_v5  ;;  %v1723_v11 = vld [vmem:[%s2121_s9 + $0x28] sm:$0xff]   ;;  %v1724_v12 = vld [vmem:[%s2121_s9 + $0x10] sm:$0xff]   ;;  %v1725_v14 = vld [vmem:[%s2121_s9 + $0x18] sm:$0xff]   ;;  %s2503_s17 = scalar_lea.vmem [#allocation8], %s1446_s8  ;;  %s1273_s28 = scalar_lea.sflag [#allocation4], %s2115_s13 }
  0x6f   : > { %v1726_v13 = vld [vmem:[%s2121_s9 + $0x30] sm:$0xff]   ;;  %v1727_v15 = vld [vmem:[%s2121_s9 + $0x38] sm:$0xff]   ;;  %v1447_v16 = vld [vmem:[%s2591_s2] ss:$0 sm:$0xff]  ;;  %p2616_p9 = scmp.ne.s32.totalorder %s2604_s30, 0 }
  0x70   : > { %1603 = vmatpush3.bf16.msra.mxu0 %v1713_v1  ;;  %1641 = vmatpush3.bf16.msra.mxu1 %v1713_v1  ;;  %v2145_v19 = vld [vmem:[%s2592_s3] ss:$0 sm:$0xff]  ;;  %s1491_s25 = sshll.u32 (%p2616_p9), %s1998_s22, 3 }
  0x71   : > { %1604 = vmatprep.subr.bf16.mxu0 %v1714_v2  ;;  %1634 = vmatprep.subr.bf16.mxu1 %v1714_v2  ;;  %s1286_s11 = ssub.s32 (%p2616_p9), 10, %s1491_s25 }
  0x72   : > { %p1287_p10 = scmp.lt.s32.totalorder (%p2616_p9), %s1286_s11, 8 }
  0x74   : > { %1605 = vmatpush3.bf16.msra.mxu0 %v1714_v2  ;;  %1642 = vmatpush3.bf16.msra.mxu1 %v1714_v2 }
  0x75   : > { %1606 = vmatprep.subr.bf16.mxu0 %v1715_v3  ;;  %1635 = vmatprep.subr.bf16.mxu1 %v1715_v3 }
  0x78   : > { %1607 = vmatpush3.bf16.msra.mxu0 %v1715_v3  ;;  %1643 = vmatpush3.bf16.msra.mxu1 %v1715_v3 }
  0x79   : > { %1608 = vmatprep.subr.bf16.mxu0 %v1716_v6  ;;  %1636 = vmatprep.subr.bf16.mxu1 %v1716_v6 }
  0x7c   : > { %1609 = vmatpush3.bf16.msra.mxu0 %v1716_v6  ;;  %1644 = vmatpush3.bf16.msra.mxu1 %v1716_v6 }
  0x7d   : > { %1610 = vmatprep.subr.bf16.mxu0 %v1717_v7  ;;  %1637 = vmatprep.subr.bf16.mxu1 %v1717_v7 }
  0x80   : > { %1611 = vmatpush3.bf16.msra.mxu0 %v1717_v7  ;;  %1645 = vmatpush3.bf16.msra.mxu1 %v1717_v7 }
  0x81   : > { %1612 = vmatprep.subr.bf16.mxu0 %v1718_v8  ;;  %1638 = vmatprep.subr.bf16.mxu1 %v1718_v8 }
  0x84   : > { %1613 = vmatpush3.bf16.msra.mxu0 %v1718_v8  ;;  %1646 = vmatpush3.bf16.msra.mxu1 %v1718_v8 }
  0x85   : > { %1614 = vmatprep.subr.bf16.mxu0 %v1719_v9  ;;  %1639 = vmatprep.subr.bf16.mxu1 %v1719_v9 }
  0x88   : > { %1615 = vmatpush3.bf16.msra.mxu0 %v1719_v9  ;;  %1647 = vmatpush3.bf16.msra.mxu1 %v1719_v9 }
  0x8b   : > { %1617 = vmatmul.mubr.bf16.vlgmr.msra.gmra.mrb[0].mxu0 %v1722_v10  ;;  %1625 = vmatmul.mubr.bf16.vlgmr.msra.gmra.mrb[0].mxu1 %v1723_v11 }
  0x8c   : > { %1620 = vmatprep.mubr.bf16.mxu0 %v1724_v12  ;;  %1628 = vmatprep.mubr.bf16.mxu1 %v1726_v13  ;;  %v594_v12 = vlaneseq }
  0x93   : > { %1621 = vmatmul.mubr.bf16.gmra.mrb[4].mxu0 %v1725_v14  ;;  %1629 = vmatmul.mubr.bf16.gmra.mrb[4].mxu1 %v1727_v15  ;;  %v595_v15 = vand.u32 127, %v594_v12 }
 0x15e   : > { %v1618_v17 = vpop.f32.mrb[0].mxu0  ;;  %v1626_v18 = vpop.f32.mrb[0].mxu1 }
 0x15f   : > { %v2147_v20 = vadd.f32 %v1618_v17, %v1447_v16  ;;  %v2149_v21 = vadd.f32 %v1626_v18, %v1447_v16  ;;  %v461_v22 = vpop.f32.mrb[1].mxu0  ;;  %v493_v23 = vpop.f32.mrb[1].mxu1  ;;  %v600_v18 = vadd.s32 4294967288, %v595_v15 }
 0x160   : > { %v2151_v24 = vadd.f32 %v1447_v16, %v461_v22  ;;  %v1619_v25 = vpop.f32.mrb[2].mxu0  ;;  %v1627_v26 = vpop.f32.mrb[2].mxu1  ;;  %v2161_v33 = vadd.f32 %v1447_v16, %v493_v23  ;;  %v2251_v22 = vshrl.u32 %v594_v12, 7 }
 0x161   : > { %v2153_v27 = vadd.f32 %v1619_v25, %v1447_v16  ;;  %v2155_v28 = vadd.f32 %v1627_v26, %v1447_v16  ;;  %v464_v29 = vpop.f32.mrb[3].mxu0  ;;  %v496_v30 = vpop.f32.mrb[3].mxu1  ;;  %v540_v31 = vmul.f32 %v2145_v19, %v2149_v21  ;;  %v532_v32 = vmul.f32 %v2145_v19, %v2147_v20 }
 0x162   : > { %v2163_v34 = vadd.f32 %v1447_v16, %v464_v29  ;;  %v2165_v35 = vadd.f32 %v1447_v16, %v496_v30  ;;  %v530_v41 = vmul.f32 %v2145_v19, %v2151_v24  ;;  %v538_v54 = vmul.f32 %v2145_v19, %v2161_v33 }
 0x163   : > { %v1545_v36 = vpack.c.bf16 %v2153_v27, %v2147_v20  ;;  %v1565_v37 = vpack.c.bf16 %v2155_v28, %v2149_v21  ;;  %566 = vadd.xlane.f32.xlu0 %v540_v31  ;;  %550 = vadd.xlane.f32.xlu1 %v532_v32  ;;  %v533_v40 = vmul.f32 %v2145_v19, %v2153_v27 }
 0x164   : > { %v1540_v38 = vpack.c.bf16 %v2163_v34, %v2151_v24  ;;  %v1560_v39 = vpack.c.bf16 %v2165_v35, %v2161_v33  ;;  %v541_v52 = vmul.f32 %v2145_v19, %v2155_v28  ;;  %v539_v0 = vmul.f32 %v2145_v19, %v2165_v35 }
 0x165   : > { %1577 = vst [vmem:[%s2177_s26 + $0x8] sm:$0xff] %v1545_v36   ;;  %1581 = vst [vmem:[%s2177_s26 + $0x28] sm:$0xff] %v1565_v37   ;;  %v531_v1 = vmul.f32 %v2145_v19, %v2163_v34  ;;  %v2258_v25 = vsub.s32 %v600_v18, %v2251_v22  ;;  %v2261_v26 = vsub.s32 %v595_v15, %v2251_v22 }
 0x166   : > { %1541 = vst [vmem:[%s2177_s26] sm:$0xff] %v1540_v38   ;;  %1580 = vst [vmem:[%s2177_s26 + $0x20] sm:$0xff] %v1560_v39   ;;  %v1622_v42 = vpop.f32.mrb[4].mxu0  ;;  %v1630_v43 = vpop.f32.mrb[4].mxu1 }
 0x167   : > { %552 = vadd.xlane.f32.xlu1 %v533_v40  ;;  %546 = vadd.xlane.f32.xlu0 %v530_v41  ;;  %v2187_v44 = vadd.f32 %v1622_v42, %v1447_v16  ;;  %v477_v45 = vpop.f32.mrb[5].mxu0  ;;  %v2189_v46 = vadd.f32 %v1630_v43, %v1447_v16  ;;  %v509_v47 = vpop.f32.mrb[5].mxu1 }
 0x168   : > { %v2191_v48 = vadd.f32 %v1447_v16, %v477_v45  ;;  %v1623_v49 = vpop.f32.mrb[6].mxu0  ;;  %v2193_v50 = vadd.f32 %v1447_v16, %v509_v47  ;;  %v1631_v51 = vpop.f32.mrb[6].mxu1 }
 0x169   : > { %v2197_v53 = vadd.f32 %v1623_v49, %v1447_v16  ;;  %v480_v55 = vpop.f32.mrb[7].mxu0  ;;  %v2201_v56 = vadd.f32 %v1631_v51, %v1447_v16  ;;  %v512_v57 = vpop.f32.mrb[7].mxu1  ;;  %v536_v3 = vmul.f32 %v2145_v19, %v2187_v44  ;;  %v544_v9 = vmul.f32 %v2145_v19, %v2189_v46 }
 0x16a   : > { %v2203_v58 = vadd.f32 %v1447_v16, %v480_v55  ;;  %v2205_v59 = vadd.f32 %v1447_v16, %v512_v57  ;;  %v534_v5 = vmul.f32 %v2145_v19, %v2191_v48  ;;  %v542_v7 = vmul.f32 %v2145_v19, %v2193_v50 }
 0x16b   : > { %568 = vadd.xlane.f32.xlu1 %v541_v52  ;;  %v1555_v60 = vpack.c.bf16 %v2197_v53, %v2187_v44  ;;  %562 = vadd.xlane.f32.xlu0 %v538_v54  ;;  %v1575_v61 = vpack.c.bf16 %v2201_v56, %v2189_v46  ;;  %v537_v2 = vmul.f32 %v2145_v19, %v2197_v53 }
 0x16c   : > { %v1550_v62 = vpack.c.bf16 %v2203_v58, %v2191_v48  ;;  %v1570_v63 = vpack.c.bf16 %v2205_v59, %v2193_v50  ;;  %v535_v4 = vmul.f32 %v2145_v19, %v2203_v58  ;;  %v543_v6 = vmul.f32 %v2145_v19, %v2205_v59 }
 0x16d   : > { %1579 = vst [vmem:[%s2177_s26 + $0x18] sm:$0xff] %v1555_v60   ;;  %1583 = vst [vmem:[%s2177_s26 + $0x38] sm:$0xff] %v1575_v61   ;;  %v545_v8 = vmul.f32 %v2145_v19, %v2201_v56 }
 0x16e   : > { %1578 = vst [vmem:[%s2177_s26 + $0x10] sm:$0xff] %v1550_v62   ;;  %1582 = vst [vmem:[%s2177_s26 + $0x30] sm:$0xff] %v1570_v63  }
 0x16f   : > { %564 = vadd.xlane.f32.xlu1 %v539_v0  ;;  %548 = vadd.xlane.f32.xlu0 %v531_v1 }
 0x173   : > { %560 = vadd.xlane.f32.xlu1 %v537_v2  ;;  %558 = vadd.xlane.f32.xlu0 %v536_v3 }
 0x177   : > { %556 = vadd.xlane.f32.xlu1 %v535_v4  ;;  %554 = vadd.xlane.f32.xlu0 %v534_v5 }
 0x17b   : > { %572 = vadd.xlane.f32.xlu1 %v543_v6  ;;  %570 = vadd.xlane.f32.xlu0 %v542_v7 }
 0x17f   : > { %576 = vadd.xlane.f32.xlu1 %v545_v8  ;;  %574 = vadd.xlane.f32.xlu0 %v544_v9 }
 0x1f0   : > { %v2239_v10 = vpop.xlane.xlu0 %566  ;;  %v2241_v11 = vpop.xlane.xlu1 %550 }
 0x1f1   : > { %v610_v37 = vrot.slane %v2241_v11, %v2261_v26  ;;  %v646_v57 = vrot.slane %v2239_v10, %v2261_v26 }
 0x1f4   : > { %v2243_v13 = vpop.xlane.xlu1 %552  ;;  %v2245_v14 = vpop.xlane.xlu0 %546 }
 0x1f5   : > { %v614_v32 = vrot.slane %v2243_v13, %v2258_v25  ;;  %v599_v36 = vrot.slane %v2245_v14, %v2261_v26 }
 0x1f7   : > { %v615_v49 = vsel %vm605_vm0, %v614_v32, %v610_v37  ;;  %v1942_v37 = vmov 0  }
 0x1f8   : > { %v2247_v16 = vpop.xlane.xlu1 %568  ;;  %v2249_v17 = vpop.xlane.xlu0 %562  ;;  %1711 = vset.pattern.permute.xlu0 %v1942_v37  ;;  %1710 = vset.pattern.permute.xlu1 %v1942_v37 }
 0x1f9   : > { %v650_v51 = vrot.slane %v2247_v16, %v2258_v25  ;;  %v637_v52 = vrot.slane %v2249_v17, %v2261_v26 }
 0x1fb   : > { %v651_v5 = vsel %vm605_vm0, %v650_v51, %v646_v57 }
 0x1fc   : > { %v2253_v19 = vpop.xlane.xlu1 %564  ;;  %v2255_v23 = vpop.xlane.xlu0 %548 }
 0x1fd   : > { %v604_v29 = vrot.slane %v2255_v23, %v2258_v25  ;;  %v641_v43 = vrot.slane %v2253_v19, %v2258_v25 }
 0x1ff   : > { %v606_v38 = vsel %vm605_vm0, %v604_v29, %v599_v36  ;;  %v642_v0 = vsel %vm605_vm0, %v641_v43, %v637_v52  ;;  %v700_v52 = vsub.s32 2, %v2251_v22 }
 0x200   : > { %v2265_v30 = vpop.xlane.xlu1 %560  ;;  %v2267_v31 = vpop.xlane.xlu0 %558  ;;  %v671_v54 = vsel %vm670_vm1, %v615_v49, %v606_v38  ;;  %v692_v38 = vsub.s32 0, %v2251_v22 }
 0x201   : > { %v632_v39 = vrot.slane %v2265_v30, %v2258_v25  ;;  %v628_v40 = vrot.slane %v2267_v31, %v2261_v26 }
 0x203   : > { %v633_v60 = vsel %vm605_vm0, %v632_v39, %v628_v40  ;;  %v696_v39 = vsub.s32 1, %v2251_v22 }
 0x204   : > { %v2280_v41 = vpop.xlane.xlu1 %556  ;;  %v2282_v42 = vpop.xlane.xlu0 %554 }
 0x205   : > { %v623_v45 = vrot.slane %v2280_v41, %v2258_v25  ;;  %v619_v47 = vrot.slane %v2282_v42, %v2261_v26 }
 0x207   : > { %v624_v55 = vsel %vm605_vm0, %v623_v45, %v619_v47  ;;  %v2600_v47 = vsub.s32 5, %v2251_v22 }
 0x208   : > { %v673_v61 = vsel %vm672_vm2, %v624_v55, %v671_v54  ;;  %v2301_v62 = vpop.xlane.xlu1 %572  ;;  %v571_v63 = vpop.xlane.xlu0 %570  ;;  %v2599_v55 = vsub.s32 6, %v2251_v22 }
 0x209   : > { %v659_v1 = vrot.slane %v2301_v62, %v2258_v25  ;;  %v655_v2 = vrot.slane %v571_v63, %v2261_v26  ;;  %v675_v3 = vsel %vm674_vm3, %v633_v60, %v673_v61 }
 0x20a   : > { %v677_v4 = vsel %vm676_vm4, %v642_v0, %v675_v3  ;;  %v2601_v3 = vsub.s32 3, %v2251_v22 }
 0x20b   : > { %v660_v8 = vsel %vm605_vm0, %v659_v1, %v655_v2  ;;  %v679_v9 = vsel %vm678_vm5, %v651_v5, %v677_v4 }
 0x20c   : > { %v2310_v6 = vpop.xlane.xlu1 %576  ;;  %v575_v7 = vpop.xlane.xlu0 %574  ;;  %v681_v29 = vsel %vm680_vm6, %v660_v8, %v679_v9 }
 0x20d   : > { %v668_v12 = vrot.slane %v2310_v6, %v2258_v25  ;;  %v664_v15 = vrot.slane %v575_v7, %v2261_v26 }
 0x20f   : > { %v669_v18 = vsel %vm605_vm0, %v668_v12, %v664_v15 }
 0x210   : > { %v683_v32 = vsel %vm682_vm7, %v669_v18, %v681_v29 }
 0x211   : > { %v686_v36 = vsel %vm685_vm8, %v683_v32, -inf }
 0x212   : > { %687 = vmax.xlane.f32.xlu0 %v686_v36  ;;  %v708_v36 = vsub.s32 4, %v2251_v22 }
 0x29f   : > { %v688_v40 = vpop.xlane.xlu0 %687 }
 0x2a0   : > { %v693_v43 = vrot.slane %v688_v40, %v692_v38  ;;  %v697_v45 = vrot.slane %v688_v40, %v696_v39  ;;  %v2335_v57 = vrot.slane %v688_v40, %v2600_v47  ;;  %v701_v0 = vrot.slane %v688_v40, %v700_v52 }
 0x2a1   : > { %v705_v12 = vrot.slane %v688_v40, %v2601_v3 }
 0x2a2   : > { %v730_v49 = vsub.f32 %v2245_v14, %v693_v43  ;;  %v731_v51 = vsub.f32 %v2255_v23, %v693_v43  ;;  %v732_v54 = vsub.f32 %v2241_v11, %v697_v45  ;;  %v733_v1 = vsub.f32 %v2243_v13, %v697_v45 }
 0x2a3   : > { %v720_v23 = vsub.s32 7, %v2251_v22  ;;  %v2343_v11 = vrot.slane %v688_v40, %v2599_v55  ;;  %v740_v2 = vsub.f32 %v2239_v10, %v2335_v57  ;;  %v734_v4 = vsub.f32 %v2282_v42, %v701_v0 }
 0x2a4   : > { %v746_v60 = vmul.f32 1.442695, %v730_v49  ;;  %v748_v61 = vmul.f32 1.442695, %v731_v51  ;;  %v750_v14 = vmul.f32 1.442695, %v732_v54  ;;  %v735_v15 = vsub.f32 %v2280_v41, %v701_v0 }
 0x2a5   : > { %v752_v5 = vmul.f32 1.442695, %v733_v1  ;;  %v721_v13 = vrot.slane %v688_v40, %v720_v23  ;;  %v742_v8 = vsub.f32 %v571_v63, %v2343_v11  ;;  %v766_v9 = vmul.f32 1.442695, %v740_v2 }
 0x2a6   : > { %1728 = vpow2.f32 %v746_v60  ;;  %v754_v18 = vmul.f32 1.442695, %v734_v4  ;;  %v736_v63 = vsub.f32 %v2267_v31, %v705_v12  ;;  %v756_v37 = vmul.f32 1.442695, %v735_v15 }
 0x2a7   : > { %1730 = vpow2.f32 %v748_v61  ;;  %v744_v29 = vsub.f32 %v575_v7, %v721_v13  ;;  %v770_v42 = vmul.f32 1.442695, %v742_v8  ;;  %v709_v7 = vrot.slane %v688_v40, %v708_v36 }
 0x2a8   : > { %1732 = vpow2.f32 %v750_v14  ;;  %v737_v45 = vsub.f32 %v2265_v30, %v705_v12  ;;  %v758_v49 = vmul.f32 1.442695, %v736_v63  ;;  %v741_v14 = vsub.f32 %v2247_v16, %v2335_v57 }
 0x2a9   : > { %1734 = vpow2.f32 %v752_v5  ;;  %v774_v43 = vmul.f32 1.442695, %v744_v29  ;;  %v738_v54 = vsub.f32 %v2249_v17, %v709_v7  ;;  %v739_v40 = vsub.f32 %v2253_v19, %v709_v7 }
 0x2aa   : > { %1736 = vpow2.f32 %v766_v9  ;;  %v760_v60 = vmul.f32 1.442695, %v737_v45  ;;  %v743_v19 = vsub.f32 %v2301_v62, %v2343_v11  ;;  %v768_v5 = vmul.f32 1.442695, %v741_v14 }
 0x2ab   : > { %1738 = vpow2.f32 %v754_v18  ;;  %v762_v0 = vmul.f32 1.442695, %v738_v54  ;;  %v764_v2 = vmul.f32 1.442695, %v739_v40  ;;  %v745_v9 = vsub.f32 %v2310_v6, %v721_v13 }
 0x2ac   : > { %1740 = vpow2.f32 %v770_v42  ;;  %v772_v16 = vmul.f32 1.442695, %v743_v19 }
 0x2ad   : > { %1742 = vpow2.f32 %v756_v37  ;;  %v776_v12 = vmul.f32 1.442695, %v745_v9 }
 0x2ae   : > { %1744 = vpow2.f32 %v774_v43 }
 0x2af   : > { %1746 = vpow2.f32 %v758_v49 }
 0x2b0   : > { %v2355_v10 = vpop.eup %1728  ;;  %1748 = vpow2.f32 %v760_v60 }
 0x2b1   : > { %v2357_v32 = vpop.eup %1730  ;;  %795 = vperm.xlu1 %1710, %v2355_v10   ;;  %1750 = vpow2.f32 %v762_v0 }
 0x2b2   : > { %798 = vperm.xlu0 %1711, %v2357_v32   ;;  %v2363_v41 = vpop.eup %1732  ;;  %1752 = vpow2.f32 %v764_v2 }
 0x2b3   : > { %v2369_v51 = vpop.eup %1734  ;;  %1754 = vpow2.f32 %v768_v5 }
 0x2b4   : > { %v2372_v31 = vpop.eup %1736  ;;  %1756 = vpow2.f32 %v772_v16 }
 0x2b5   : > { %801 = vperm.xlu1 %1710, %v2363_v41   ;;  %v2376_v61 = vpop.eup %1738  ;;  %1758 = vpow2.f32 %v776_v12 }
 0x2b6   : > { %825 = vperm.xlu0 %1711, %v2372_v31   ;;  %v2379_v30 = vpop.eup %1740 }
 0x2b7   : > { %v2383_v1 = vpop.eup %1742 }
 0x2b8   : > { %v2386_v17 = vpop.eup %1744 }
 0x2b9   : > { %804 = vperm.xlu1 %1710, %v2369_v51   ;;  %v2391_v4 = vpop.eup %1746 }
 0x2ba   : > { %831 = vperm.xlu0 %1711, %v2379_v30   ;;  %v2396_v8 = vpop.eup %1748 }
 0x2bb   : > { %v2400_v57 = vpop.eup %1750 }
 0x2bc   : > { %v2403_v15 = vpop.eup %1752 }
 0x2bd   : > { %807 = vperm.xlu1 %1710, %v2376_v61   ;;  %v2406_v62 = vpop.eup %1754 }
 0x2be   : > { %837 = vperm.xlu0 %1711, %v2386_v17   ;;  %v2409_v11 = vpop.eup %1756 }
 0x2bf   : > { %v2412_v6 = vpop.eup %1758 }
 0x2c1   : > { %810 = vperm.xlu1 %1710, %v2383_v1  }
 0x2c5   : > { %813 = vperm.xlu1 %1710, %v2391_v4  }
 0x2c9   : > { %816 = vperm.xlu1 %1710, %v2396_v8  }
 0x2cd   : > { %819 = vperm.xlu1 %1710, %v2400_v57  }
 0x2d1   : > { %822 = vperm.xlu1 %1710, %v2403_v15  }
 0x2d5   : > { %828 = vperm.xlu1 %1710, %v2406_v62  }
 0x2d9   : > { %834 = vperm.xlu1 %1710, %v2409_v11  }
 0x2dd   : > { %840 = vperm.xlu1 %1710, %v2412_v6  }
 0x330   : > { %v796_v13 = vpop.permute.xlu1 %795 }
 0x331   : > { %v799_v43 = vpop.permute.xlu0 %798  ;;  %v845_v19 = vrot.slane %v796_v13, %v2261_v26 }
 0x332   : > { %v849_v2 = vrot.slane %v799_v43, %v2258_v25 }
 0x334   : > { %v802_v18 = vpop.permute.xlu1 %801  ;;  %v850_v13 = vsel %vm605_vm0, %v849_v2, %v845_v19 }
 0x335   : > { %v826_v49 = vpop.permute.xlu0 %825  ;;  %v854_v5 = vrot.slane %v802_v18, %v2261_v26 }
 0x336   : > { %v890_v18 = vrot.slane %v826_v49, %v2261_v26 }
 0x338   : > { %v805_v29 = vpop.permute.xlu1 %804 }
 0x339   : > { %v858_v60 = vrot.slane %v805_v29, %v2258_v25  ;;  %v832_v40 = vpop.permute.xlu0 %831 }
 0x33b   : > { %v859_v55 = vsel %vm605_vm0, %v858_v60, %v854_v5 }
 0x33c   : > { %v808_v42 = vpop.permute.xlu1 %807  ;;  %v914_v60 = vsel %vm670_vm1, %v859_v55, %v850_v13 }
 0x33d   : > { %v863_v16 = vrot.slane %v808_v42, %v2261_v26 }
 0x340   : > { %v811_v63 = vpop.permute.xlu1 %810 }
 0x341   : > { %v867_v0 = vrot.slane %v811_v63, %v2258_v25 }
 0x343   : > { %v868_v63 = vsel %vm605_vm0, %v867_v0, %v863_v16 }
 0x344   : > { %v814_v37 = vpop.permute.xlu1 %813  ;;  %v915_v0 = vsel %vm672_vm2, %v868_v63, %v914_v60 }
 0x345   : > { %v872_v29 = vrot.slane %v814_v37, %v2261_v26  ;;  %v838_v37 = vpop.permute.xlu0 %837 }
 0x346   : > { %v908_v19 = vrot.slane %v838_v37, %v2261_v26 }
 0x348   : > { %v817_v7 = vpop.permute.xlu1 %816 }
 0x349   : > { %v876_v9 = vrot.slane %v817_v7, %v2258_v25 }
 0x34b   : > { %v877_v7 = vsel %vm605_vm0, %v876_v9, %v872_v29 }
 0x34c   : > { %v820_v45 = vpop.permute.xlu1 %819  ;;  %v916_v5 = vsel %vm674_vm3, %v877_v7, %v915_v0 }
 0x34d   : > { %v881_v43 = vrot.slane %v820_v45, %v2261_v26 }
 0x350   : > { %v823_v54 = vpop.permute.xlu1 %822 }
 0x351   : > { %v885_v12 = vrot.slane %v823_v54, %v2258_v25  ;;  %v899_v54 = vrot.slane %v832_v40, %v2261_v26 }
 0x354   : > { %v829_v14 = vpop.permute.xlu1 %828 }
 0x355   : > { %v894_v47 = vrot.slane %v829_v14, %v2258_v25  ;;  %v886_v14 = vsel %vm605_vm0, %v885_v12, %v881_v43 }
 0x357   : > { %v895_v45 = vsel %vm605_vm0, %v894_v47, %v890_v18 }
 0x358   : > { %v835_v3 = vpop.permute.xlu1 %834 }
 0x359   : > { %v903_v42 = vrot.slane %v835_v3, %v2258_v25  ;;  %v917_v3 = vsel %vm676_vm4, %v886_v14, %v916_v5 }
 0x35a   : > { %v918_v55 = vsel %vm678_vm5, %v895_v45, %v917_v3 }
 0x35b   : > { %v904_v2 = vsel %vm605_vm0, %v903_v42, %v899_v54 }
 0x35c   : > { %v841_v49 = vpop.permute.xlu1 %840  ;;  %v919_v16 = vsel %vm680_vm6, %v904_v2, %v918_v55 }
 0x35d   : > { %v912_v40 = vrot.slane %v841_v49, %v2258_v25 }
 0x35f   : > { %v913_v9 = vsel %vm605_vm0, %v912_v40, %v908_v19 }
 0x360   : > { %v920_v12 = vsel %vm682_vm7, %v913_v9, %v919_v16 }
 0x361   : > { %v922_v47 = vsel %vm685_vm8, %v920_v12, 0.0 }
 0x362   : > { %923 = vadd.xlane.f32.xlu0 %v922_v47 }
 0x3ef   : > { %v924_v29 = vpop.xlane.xlu0 %923 }
 0x3f0   : > { %v945_v63 = vrot.slane %v924_v29, %v708_v36  ;;  %v929_v26 = vrot.slane %v924_v29, %v692_v38  ;;  %v957_v25 = vrot.slane %v924_v29, %v720_v23  ;;  %v933_v43 = vrot.slane %v924_v29, %v696_v39 }
 0x3f1   : > { %v937_v36 = vrot.slane %v924_v29, %v700_v52  ;;  %v2613_v39 = vsub.s32 3, %v2251_v22 }
 0x3f2   : > { %1760 = vrcp.f32 %v945_v63 }
 0x3f3   : > { %1762 = vrcp.f32 %v929_v26  ;;  %v941_v37 = vrot.slane %v924_v29, %v2613_v39 }
 0x3f4   : > { %1764 = vrcp.f32 %v957_v25 }
 0x3f5   : > { %1766 = vrcp.f32 %v933_v43 }
 0x3f6   : > { %1768 = vrcp.f32 %v937_v36 }
 0x3f7   : > { %1770 = vrcp.f32 %v941_v37 }
 0x3fc   : > { %v1761_v13 = vpop.eup %1760 }
 0x3fd   : > { %v1763_v18 = vpop.eup %1762  ;;  %v979_v7 = vmul.f32 %v1761_v13, %v2400_v57 }
 0x3fe   : > { %v1765_v42 = vpop.eup %1764  ;;  %v967_v38 = vmul.f32 %v1763_v18, %v2355_v10  ;;  %v968_v54 = vmul.f32 %v1763_v18, %v2357_v32 }
 0x3ff   : > { %1032 = vperm.xlu0 %1711, %v979_v7   ;;  %v988_v23 = vmul.f32 %v1765_v42, %v2386_v17  ;;  %v1767_v60 = vpop.eup %1766  ;;  %v2614_v17 = vsub.s32 5, %v2251_v22 }
 0x400   : > { %992 = vperm.xlu1 %1710, %v967_v38   ;;  %v970_v57 = vmul.f32 %v1767_v60, %v2363_v41  ;;  %v971_v52 = vmul.f32 %v1767_v60, %v2369_v51  ;;  %v1769_v10 = vpop.eup %1768  ;;  %v2615_v41 = vsub.s32 6, %v2251_v22 }
 0x401   : > { %v973_v14 = vmul.f32 %v1769_v10, %v2376_v61  ;;  %v949_v32 = vrot.slane %v924_v29, %v2614_v17  ;;  %v974_v0 = vmul.f32 %v1769_v10, %v2383_v1  ;;  %v1771_v45 = vpop.eup %1770  ;;  %v980_v61 = vmul.f32 %v1761_v13, %v2403_v15 }
 0x402   : > { %v976_v5 = vmul.f32 %v1771_v45, %v2391_v4  ;;  %v953_v2 = vrot.slane %v924_v29, %v2615_v41  ;;  %v977_v51 = vmul.f32 %v1771_v45, %v2396_v8  ;;  %v989_v8 = vmul.f32 %v1765_v42, %v2412_v6 }
 0x403   : > { %1062 = vperm.xlu0 %1711, %v988_v23   ;;  %1772 = vrcp.f32 %v949_v32 }
 0x404   : > { %997 = vperm.xlu1 %1710, %v968_v54   ;;  %1774 = vrcp.f32 %v953_v2 }
 0x408   : > { %1002 = vperm.xlu1 %1710, %v970_v57  }
 0x40c   : > { %1007 = vperm.xlu1 %1710, %v971_v52  }
 0x40d   : > { %v1773_v49 = vpop.eup %1772 }
 0x40e   : > { %v982_v19 = vmul.f32 %v1773_v49, %v2372_v31  ;;  %v983_v1 = vmul.f32 %v1773_v49, %v2406_v62  ;;  %v1775_v3 = vpop.eup %1774 }
 0x40f   : > { %v985_v4 = vmul.f32 %v1775_v3, %v2379_v30  ;;  %v986_v22 = vmul.f32 %v1775_v3, %v2409_v11 }
 0x410   : > { %1012 = vperm.xlu1 %1710, %v973_v14  }
 0x414   : > { %1017 = vperm.xlu1 %1710, %v974_v0  }
 0x418   : > { %1022 = vperm.xlu1 %1710, %v976_v5  }
 0x41c   : > { %1027 = vperm.xlu1 %1710, %v977_v51  }
 0x420   : > { %1037 = vperm.xlu1 %1710, %v980_v61  }
 0x424   : > { %1042 = vperm.xlu1 %1710, %v982_v19  }
 0x428   : > { %1047 = vperm.xlu1 %1710, %v983_v1  }
 0x42c   : > { %1052 = vperm.xlu1 %1710, %v985_v4  }
 0x430   : > { %1057 = vperm.xlu1 %1710, %v986_v22  }
 0x434   : > { %1067 = vperm.xlu1 %1710, %v989_v8  }
 0x47e   : > { %v1033_v6 = vpop.permute.xlu0 %1032 }
 0x47f   : > { %v993_v40 = vpop.permute.xlu1 %992 }
 0x480   : > { %v1070_v26 = vmul.f32 %v993_v40, %v2151_v24 }
 0x482   : > { %v1063_v19 = vpop.permute.xlu0 %1062 }
 0x483   : > { %v998_v15 = vpop.permute.xlu1 %997 }
 0x484   : > { %v1071_v47 = vmul.f32 %v998_v15, %v2163_v34  ;;  %v1078_v34 = vmul.f32 %v1033_v6, %v2161_v33  ;;  %v1084_v15 = vmul.f32 %v1063_v19, %v2189_v46 }
 0x486   : > { %v1086_v18 = vadd.f32 %v1071_v47, %v1070_v26 }
 0x487   : > { %v1003_v55 = vpop.permute.xlu1 %1002 }
 0x488   : > { %v1072_v11 = vmul.f32 %v1003_v55, %v2147_v20  ;;  %v1087_v38 = vrot.slane %v1086_v18, 4 }
 0x48b   : > { %v1008_v9 = vpop.permute.xlu1 %1007 }
 0x48c   : > { %v1073_v62 = vmul.f32 %v1008_v9, %v2153_v27 }
 0x48e   : > { %v1093_v43 = vadd.f32 %v1073_v62, %v1072_v11 }
 0x48f   : > { %v1013_v16 = vpop.permute.xlu1 %1012 }
 0x490   : > { %v1074_v25 = vmul.f32 %v1013_v16, %v2191_v48  ;;  %v1094_v42 = vrot.slane %v1093_v43, 4  ;;  %v1088_v48 = vadd.f32 %v1087_v38, %v1086_v18 }
 0x492   : > { %v1095_v60 = vadd.f32 %v1094_v42, %v1093_v43 }
 0x493   : > { %v1018_v31 = vpop.permute.xlu1 %1017 }
 0x494   : > { %v1075_v30 = vmul.f32 %v1018_v31, %v2203_v58  ;;  %v1096_v10 = vrot.slane %v1095_v60, 2 }
 0x496   : > { %v1100_v7 = vadd.f32 %v1075_v30, %v1074_v25  ;;  %v1097_v41 = vadd.f32 %v1096_v10, %v1095_v60 }
 0x497   : > { %v1023_v12 = vpop.permute.xlu1 %1022 }
 0x498   : > { %v1076_v13 = vmul.f32 %v1023_v12, %v2187_v44  ;;  %v1098_v22 = vrot.slane %v1097_v41, 1 }
 0x49a   : > { %v1099_v30 = vadd.f32 %v1098_v22, %v1097_v41 }
 0x49b   : > { %v1028_v29 = vpop.permute.xlu1 %1027 }
 0x49c   : > { %v1077_v63 = vmul.f32 %v1028_v29, %v2197_v53  ;;  %v1101_v53 = vrot.slane %v1100_v7, 4 }
 0x49e   : > { %v1107_v36 = vadd.f32 %v1077_v63, %v1076_v13  ;;  %v1102_v39 = vadd.f32 %v1101_v53, %v1100_v7  ;;  %v1525_v13 = vpack.c.bf16 %v1099_v30, %v1099_v30 }
 0x49f   : > { %v1038_v27 = vpop.permute.xlu1 %1037 }
 0x4a0   : > { %v1079_v58 = vmul.f32 %v1038_v27, %v2165_v35  ;;  %v1108_v54 = vrot.slane %v1107_v36, 4  ;;  %v1089_v35 = vrot.slane %v1088_v48, 2  ;;  %v1103_v17 = vrot.slane %v1102_v39, 2 }
 0x4a2   : > { %v1114_v20 = vadd.f32 %v1079_v58, %v1078_v34  ;;  %v1109_v44 = vadd.f32 %v1108_v54, %v1107_v36  ;;  %v1090_v51 = vadd.f32 %v1089_v35, %v1088_v48  ;;  %v1104_v61 = vadd.f32 %v1103_v17, %v1102_v39 }
 0x4a3   : > { %v1043_v23 = vpop.permute.xlu1 %1042 }
 0x4a4   : > { %v1115_v24 = vrot.slane %v1114_v20, 4  ;;  %v1080_v57 = vmul.f32 %v1043_v23, %v2149_v21  ;;  %v1110_v0 = vrot.slane %v1109_v44, 2  ;;  %v1105_v55 = vrot.slane %v1104_v61, 1 }
 0x4a5   : > { %v1091_v16 = vrot.slane %v1090_v51, 1 }
 0x4a6   : > { %v1116_v33 = vadd.f32 %v1115_v24, %v1114_v20  ;;  %v1111_v1 = vadd.f32 %v1110_v0, %v1109_v44  ;;  %v1106_v63 = vadd.f32 %v1105_v55, %v1104_v61  ;;  %v1255_v20 = vunpack.c.l.b16 %v1525_v13 }
 0x4a7   : > { %v1048_v37 = vpop.permute.xlu1 %1047 }
 0x4a8   : > { %v1081_v52 = vmul.f32 %v1048_v37, %v2155_v28  ;;  %v1117_v5 = vrot.slane %v1116_v33, 2  ;;  %v1112_v31 = vrot.slane %v1111_v1, 1  ;;  %v1526_v27 = vpack.c.bf16 %v1106_v63, %v1106_v63 }
 0x4aa   : > { %v1121_v14 = vadd.f32 %v1081_v52, %v1080_v57  ;;  %v1118_v4 = vadd.f32 %v1117_v5, %v1116_v33  ;;  %v1113_v6 = vadd.f32 %v1112_v31, %v1111_v1  ;;  %v1256_v54 = vunpack.c.l.b16 %v1526_v27 }
 0x4ab   : > { %v1053_v32 = vpop.permute.xlu1 %1052 }
 0x4ac   : > { %v1122_v45 = vrot.slane %v1121_v14, 4  ;;  %v1082_v21 = vmul.f32 %v1053_v32, %v2193_v50  ;;  %v1119_v47 = vrot.slane %v1118_v4, 1  ;;  %v1527_v36 = vpack.c.bf16 %v1113_v6, %v1113_v6 }
 0x4ae   : > { %v1123_v2 = vadd.f32 %v1122_v45, %v1121_v14  ;;  %v1120_v43 = vadd.f32 %v1119_v47, %v1118_v4  ;;  %v1257_v60 = vunpack.c.l.b16 %v1527_v36 }
 0x4af   : > { %v1058_v49 = vpop.permute.xlu1 %1057 }
 0x4b0   : > { %v1124_v3 = vrot.slane %v1123_v2, 2  ;;  %v1083_v28 = vmul.f32 %v1058_v49, %v2205_v59  ;;  %v1092_v59 = vadd.f32 %v1091_v16, %v1090_v51  ;;  %v1528_v42 = vpack.c.bf16 %v1120_v43, %v1120_v43 }
 0x4b2   : > { %v1125_v8 = vadd.f32 %v1124_v3, %v1123_v2  ;;  %v1128_v40 = vadd.f32 %v1083_v28, %v1082_v21  ;;  %v1524_v34 = vpack.c.bf16 %v1092_v59, %v1092_v59  ;;  %v1258_v37 = vunpack.c.l.b16 %v1528_v42 }
 0x4b3   : > { %v1068_v9 = vpop.permute.xlu1 %1067 }
 0x4b4   : > { %v1129_v12 = vrot.slane %v1128_v40, 4  ;;  %v1085_v62 = vmul.f32 %v1068_v9, %v2201_v56  ;;  %v1126_v29 = vrot.slane %v1125_v8, 1  ;;  %v1254_v24 = vunpack.c.l.b16 %v1524_v34 }
 0x4b6   : > { %v1130_v11 = vadd.f32 %v1129_v12, %v1128_v40  ;;  %v1135_v50 = vadd.f32 %v1085_v62, %v1084_v15  ;;  %v1127_v46 = vadd.f32 %v1126_v29, %v1125_v8  ;;  %v1262_v44 = vsel %vm670_vm1, %v1255_v20, %v1254_v24 }
 0x4b7   : > { %v1263_v33 = vsel %vm672_vm2, %v1256_v54, %v1262_v44 }
 0x4b8   : > { %v1131_v26 = vrot.slane %v1130_v11, 2  ;;  %v1136_v25 = vrot.slane %v1135_v50, 4  ;;  %v1529_v38 = vpack.c.bf16 %v1127_v46, %v1127_v46  ;;  %v1264_v14 = vsel %vm674_vm3, %v1257_v60, %v1263_v33 }
 0x4b9   : > { %v1265_v17 = vsel %vm676_vm4, %v1258_v37, %v1264_v14 }
 0x4ba   : > { %v1132_v18 = vadd.f32 %v1131_v26, %v1130_v11  ;;  %v1137_v7 = vadd.f32 %v1136_v25, %v1135_v50  ;;  %v1259_v57 = vunpack.c.l.b16 %v1529_v38 }
 0x4bc   : > { %v1133_v58 = vrot.slane %v1132_v18, 1  ;;  %v1138_v56 = vrot.slane %v1137_v7, 2  ;;  %v1266_v32 = vsel %vm678_vm5, %v1259_v57, %v1265_v17 }
 0x4be   : > { %v1134_v53 = vadd.f32 %v1133_v58, %v1132_v18  ;;  %v1139_v23 = vadd.f32 %v1138_v56, %v1137_v7 }
 0x4c0   : > { %v1530_v48 = vpack.c.bf16 %v1134_v53, %v1134_v53  ;;  %v1140_v39 = vrot.slane %v1139_v23, 1 }
 0x4c2   : > { %v1141_v52 = vadd.f32 %v1140_v39, %v1139_v23  ;;  %v1260_v10 = vunpack.c.l.b16 %v1530_v48 }
 0x4c4   : > { %v1531_v35 = vpack.c.bf16 %v1141_v52, %v1141_v52  ;;  %v1267_v45 = vsel %vm680_vm6, %v1260_v10, %v1266_v32 }
 0x4c5   : > { %1284 = sbr.rel (!%p2616_p9) target bundleno = 1256 (0x4e8), region = 48 }
 0x4c6   : > { %v1261_v0 = vunpack.c.l.b16 %v1531_v35 }
 0x4c8   : > { %v1268_v5 = vsel %vm682_vm7, %v1261_v0, %v1267_v45 }
 0x4c9   : > { %v1269_v41 = vpack.c.b16 %v1268_v5, %v1268_v5 }
 0x4cb   : > { %1271 = vst [vmem:[%s2503_s17] sm:$0xf] %v1269_v41 }
 0x4cc   : > { %s2627_s11 = smov (!%p1287_p10, %s1286_s11), 8 }
 0x4cd   : > { %s2511_s12 = sshll.u32 %s2627_s11, 7 }
 0x4ce   : > { %s1292_s14 = ssub.s32 1024, %s2511_s12 }
 0x4cf   : > { %1293 = vsyncadd %s1273_s28, %s1292_s14  ;;  %p1494_p1 = scmp.ne.s32.totalorder %s2511_s12, 0  ;;  %s1534_s15 = sshll.u32 %s1998_s22, 10 }
 0x4d0   : > { %s2521_s7 = scalar_lea.hbm %s2593_s4, %s1534_s15  ;;  %s1300_s10 = sshll.u32 %s2177_s26, 4  ;;  %s2524_s10 = int_to_ptr.vmem [resolvable:$true] %s1300_s10 }
 0x4d1   : > { %s1832_s16 = scalar_lea.vmem %s2524_s10, %s2511_s12  ;;  %s1943_s8 = smov [#allocation7]  }
 0x4d2   : > { %p1833_p4 = scmp.ne.s32.totalorder %s2524_s10, %s1832_s16  ;;  %s1836_s25 = sshll.u32 %s1943_s8, 4  ;;  %s1837_s25 = int_to_ptr.vmem [resolvable:$false] %s1836_s25 }
 0x4d3   : > { %s1838_s11 = scalar_lea.vmem %s1837_s25, 2048  ;;  %p1839_p12 = scmp.lt.s32.totalorder %s2524_s10, %s1837_s25 }
 0x4d4   : > { %p1834_p5 = pnand %p1833_p4, %p1494_p1  ;;  %p1840_p2 = scmp.lt.s32.totalorder %s1838_s11, %s1832_s16 }
 0x4d6   : > { %p1835_p11 = pneg %p1834_p5  ;;  %p1841_p3 = por %p1840_p2, %p1839_p12 }
 0x4d8   : > { %p1842_p13 = pnand %p1841_p3, %p1835_p11 }
 0x4da   : > { %1845 = shalt.err (!%p1842_p13)
}
 0x4db   : > { %s1846_s26 = scalar_lea.hbm %s2521_s7, %s2511_s12  ;;  %s1850_s9 = scalar_lea.hbm %s2593_s4, 1280 }
 0x4dc   : > { %p1847_p7 = scmp.ne.s32.totalorder %s2521_s7, %s1846_s26  ;;  %p1851_p9 = scmp.lt.u32.totalorder %s2521_s7, %s2593_s4 }
 0x4dd   : > { %p1852_p10 = scmp.lt.u32.totalorder %s1850_s9, %s1846_s26  ;;  %p1854_p5 = scmp.lt.u32.totalorder %s1846_s26, %s2521_s7 }
 0x4de   : > { %p1848_p6 = pnand %p1847_p7, %p1494_p1 }
 0x4df   : > { %p1853_p4 = por %p1852_p10, %p1851_p9 }
 0x4e0   : > { %p1849_p8 = pneg %p1848_p6 }
 0x4e1   : > { %p1855_p11 = por %p1854_p5, %p1853_p4 }
 0x4e3   : > { %p1856_p12 = pnand %p1855_p11, %p1849_p8 }
 0x4e5   : > { %1859 = shalt.err (!%p1856_p12)
}
 0x4e6   : > { %s1944_s8 = smov 64   ;;  %s1945_s25 = smov 4  }
 0x4e7   : > { %1306 = dma.vmem_to_hbm [thread:$0]  (%p1494_p1), %s2524_s10, %s2511_s12, %s2521_s7, %s1273_s28, %s1944_s8, %s1944_s8, %s1945_s25  }
 0x4e8 PF: > { %s1500_s11 = sshll.u32 %s1998_s22, 6  ;;  %s1316_s14 = sshll.u32 %s2503_s17, 4  ;;  %s1317_s14 = int_to_ptr.vmem [resolvable:$true] %s1316_s14 }
 0x4e9   : > { %s1314_s9 = scalar_lea.hbm %s2594_s5, %s1500_s11  ;;  %s1860_s29 = scalar_lea.vmem %s1317_s14, 64 }
 0x4ea   : > { %p1861_p2 = scmp.ne.s32.totalorder %s1317_s14, %s1860_s29  ;;  %p2617_p3 = scmp.ne.s32.totalorder %s2604_s30, 0 }
 0x4eb   : > { %s1946_s16 = smov [#allocation8]  }
 0x4ec   : > { %p1862_p13 = pnand %p1861_p2, %p2617_p3  ;;  %s1864_s23 = sshll.u32 %s1946_s16, 4  ;;  %s1865_s23 = int_to_ptr.vmem [resolvable:$false] %s1864_s23 }
 0x4ed   : > { %s1866_s28 = scalar_lea.vmem %s1865_s23, 128  ;;  %p1867_p1 = scmp.lt.s32.totalorder %s1317_s14, %s1865_s23 }
 0x4ee   : > { %p1863_p7 = pneg %p1862_p13  ;;  %p1868_p6 = scmp.lt.s32.totalorder %s1866_s28, %s1860_s29 }
 0x4f0   : > { %p1869_p8 = por %p1868_p6, %p1867_p1 }
 0x4f2   : > { %p1870_p9 = pnand %p1869_p8, %p1863_p7 }
 0x4f4   : > { %1873 = shalt.err (!%p1870_p9)
}
 0x4f5   : > { %s1874_s22 = scalar_lea.hbm %s1314_s9, 64  ;;  %s1878_s7 = scalar_lea.hbm %s2594_s5, 128 }
 0x4f6   : > { %p1875_p10 = scmp.ne.s32.totalorder %s1314_s9, %s1874_s22  ;;  %p1879_p11 = scmp.lt.u32.totalorder %s1314_s9, %s2594_s5 }
 0x4f7   : > { %p1880_p12 = scmp.lt.u32.totalorder %s1878_s7, %s1874_s22  ;;  %p1882_p13 = scmp.lt.u32.totalorder %s1874_s22, %s1314_s9 }
 0x4f8   : > { %p1876_p4 = pnand %p1875_p10, %p2617_p3 }
 0x4f9   : > { %p1881_p2 = por %p1880_p12, %p1879_p11 }
 0x4fa   : > { %p1877_p5 = pneg %p1876_p4 }
 0x4fb   : > { %p1883_p1 = por %p1882_p13, %p1881_p2 }
 0x4fd   : > { %p1884_p7 = pnand %p1883_p1, %p1877_p5 }
 0x4ff   : > { %1887 = shalt.err (!%p1884_p7)
}
 0x500   : > { %s2618_s23 = scalar_lea.sflag [#allocation9], %s2115_s13 }
 0x501   : > { %1653 = dma.vmem_to_hbm [thread:$0]  (%p2617_p3), %s1317_s14, 64, %s1314_s9, %s2618_s23  }
 0x502 PF: > { %s1328_s25 = sand.u32 1, %s1922_s18   ;;  %p2619_p6 = scmp.ne.s32.totalorder %s2605_s6, 0 }
 0x503   : > { %s1329_s11 = scalar_lea.sflag [#allocation4], %s1328_s25 }
 0x504   : > { %p1661_p8 = pnand %p1431_p0, %p2619_p6 }
 0x506   : > { %1913 = dma.done.wait (!%p1661_p8), %s1329_s11, 1024  }
 0x507   : > { %1915 = vsyncadd (!%p1661_p8), %s1329_s11, 4294966272  ;;  %s1338_s26 = scalar_lea.sflag [#allocation9], %s1328_s25 }
 0x508   : > { %1917 = dma.done.wait (!%p1661_p8), %s1338_s26, 64  }
 0x509   : > { %1919 = vsyncadd (!%p1661_p8), %s1338_s26, 4294967232  ;;  %p23_p3 = scmp.ge.s32.totalorder %s2002_s24, 4   ;;  %s2620_s18 = smov %s1926_s19 }
 0x50a   : > { %s2621_s19 = smov %s1930_s20  ;;  %s2622_s20 = smov %s2014_s27 }
 0x50b   : > { %s2623_s21 = smov %s2002_s24  ;;  %25 = sbr.rel (!%p23_p3) target bundleno = 8 (0x8), region = 102 }
 0x512   :  { %1343 = vsyncpa [#allocation3], 1 }
 0x513   :  { %1345 = vsyncpa [#allocation3 + $0x1], 1 }
 0x514   :  { %1346 = vsyncpa [#allocation6], 1 }
 0x515   :  { %1347 = vsyncpa [#allocation4], 1 }
 0x516   :  { %1349 = vsyncpa [#allocation4 + $0x1], 1 }
 0x517   :  { %1350 = vsyncpa [#allocation9], 1 }
 0x518   :  { %1352 = vsyncpa [#allocation9 + $0x1], 1 }

</bundles_post_ra>
